<compile_context>
chip_gen: v6e
topology: v6e:2x2x1
jax: 0.10.0
libtpu: 0.0.40
codegen_flags: <defaults>
</compile_context>

<pallas_src>
import functools

import jax
import jax.numpy as jnp
from jax import lax
from jax.experimental import pallas as pl
from jax.experimental.pallas import tpu as pltpu


# ----------------------------------------------------------------------------
# Fused kernel: all layers + all time steps for one batch block.
#   refs = (x_ref, [w_ih, w_hh, bias] * num_layers, o_ref)
#   x_ref : (Bb, S, I)   f32  (cast to compute dtype on-chip)
#   w_ih  : (F_l, H)     f32
#   w_hh  : (H, H)       f32
#   bias  : (1, H)       f32  (b_ih + b_hh, pre-fused)
#   o_ref : (Bb, S, H)   f32  (also used as the inter-layer buffer)
# ----------------------------------------------------------------------------
def _fused_rnn_kernel(*refs, num_layers, act_type, compute_dtype):
    x_ref, o_ref = refs[0], refs[-1]
    w_refs = refs[1:-1]

    Bb, S, _ = x_ref.shape
    H = o_ref.shape[-1]
    act = jnp.tanh if act_type == "tanh" else (lambda v: jnp.maximum(v, 0.0))
    cdt = compute_dtype

    # Read the batch_first input once and cast on-chip.
    inp = x_ref[...].astype(cdt)                              # (Bb, S, I)

    for l in range(num_layers):
        w_ih = w_refs[3 * l][...].astype(cdt)                 # (F_l, H)
        w_hh = w_refs[3 * l + 1][...].astype(cdt)             # (H, H)
        bias = w_refs[3 * l + 2][...]                         # (1, H) f32

        # One MXU matmul covering the x-projection of every time step:
        # (Bb, S, F_l) x (F_l, H) -> (Bb, S, H), f32 accumulation.
        xp = lax.dot_general(
            inp, w_ih,
            dimension_numbers=(((2,), (0,)), ((), ())),
            preferred_element_type=jnp.float32)
        xp = xp + bias                                        # (1,H) broadcast

        # Sequential recurrence: one small MXU matmul per step; h kept in f32
        # (only the matmul LHS is cast), so bf16 rounding does not compound
        # through the state.
        h = jnp.zeros((Bb, H), jnp.float32)
        for t in range(S):      # S is small & static here; see TODO above.
            pre = xp[:, t, :] + jnp.dot(
                h.astype(cdt), w_hh, preferred_element_type=jnp.float32)
            h = act(pre)
            # Store straight into the output VMEM block: bounds live ranges
            # to `h` and makes o_ref the next layer's input buffer.
            o_ref[:, t, :] = h.astype(o_ref.dtype)

        if l + 1 < num_layers:
            inp = o_ref[...].astype(cdt)                      # (Bb, S, H)


# ----------------------------------------------------------------------------
# Wrapper.
# ----------------------------------------------------------------------------
def _pick_batch_blocks(batch, requested):
    n = max(1, min(int(requested), batch))
    while batch % n:
        n -= 1
    # Only split if every block keeps a sublane-full (>=8) batch: otherwise
    # the split just serializes the recurrence (v5e/v6e have 1 TensorCore)
    # and starves the per-step MXU matmul of rows.
    if n > 1 and batch // n < 8:
        n = 1
    return n


def many_to_many_forward(x_bf, weights, act_type,
                         compute_dtype=jnp.bfloat16,
                         num_batch_blocks=1):
    """x_bf: (batch, seq, input_size), batch_first.  Returns (batch, seq, H)."""
    B, S, I = x_bf.shape
    H = weights[0]["w_hh_t"].shape[1]
    L = len(weights)

    n_blocks = _pick_batch_blocks(B, num_batch_blocks)
    Bb = B // n_blocks

    # Inputs stay f32 in HBM; casts happen on-chip inside the kernel.
    inputs = [x_bf]
    in_specs = [pl.BlockSpec((Bb, S, I), lambda b: (b, 0, 0))]
    for layer in weights:
        in_sz = layer["w_ih_t"].shape[0]
        inputs += [layer["w_ih_t"], layer["w_hh_t"], layer["b"]]
        in_specs += [pl.BlockSpec((in_sz, H), lambda b: (0, 0)),
                     pl.BlockSpec((H, H), lambda b: (0, 0)),
                     pl.BlockSpec((1, H), lambda b: (0, 0))]

    kernel = functools.partial(_fused_rnn_kernel, num_layers=L,
                               act_type=act_type, compute_dtype=compute_dtype)

    return pl.pallas_call(
        kernel,
        out_shape=jax.ShapeDtypeStruct((B, S, H), jnp.float32),
        grid_spec=pltpu.PrefetchScalarGridSpec(
            num_scalar_prefetch=0,
            grid=(n_blocks,),
            in_specs=in_specs,
            out_specs=pl.BlockSpec((Bb, S, H), lambda b: (b, 0, 0)),
        ),
        compiler_params=pltpu.CompilerParams(
            dimension_semantics=("parallel",)),   # batch blocks independent
    )(*inputs)


# ----------------------------------------------------------------------------
# Pure-JAX reference (mirrors torch.nn.RNN math, f32) for correctness checks.
# ----------------------------------------------------------------------------
def _reference(x_bf, weights, act_type):
    act = jnp.tanh if act_type == "tanh" else (lambda v: jnp.maximum(v, 0.0))
    x_tm = jnp.transpose(x_bf, (1, 0, 2)).astype(jnp.float32)
    S, B, _ = x_tm.shape
    inp = x_tm
    for layer in weights:
        H = layer["w_hh_t"].shape[0]
        h = jnp.zeros((B, H), jnp.float32)
        outs = []
        for t in range(S):
            h = act(inp[t] @ layer["w_ih_t"] + h @ layer["w_hh_t"] + layer["b"])
            outs.append(h)
        inp = jnp.stack(outs, axis=0)
    return jnp.transpose(inp, (1, 0, 2))


# ----------------------------------------------------------------------------
# Deterministic parameter init (shapes follow torch.nn.RNN), synthetic values.
# ----------------------------------------------------------------------------
def init_params(key, input_size, hidden_size, num_layers, bias):
    bound = 1.0 / jnp.sqrt(hidden_size)
    weights = []
    for l in range(num_layers):
        in_sz = input_size if l == 0 else hidden_size
        key, k1, k2, k3, k4 = jax.random.split(key, 5)
        w_ih = jax.random.uniform(k1, (hidden_size, in_sz),
                                  minval=-bound, maxval=bound)
        w_hh = jax.random.uniform(k2, (hidden_size, hidden_size),
                                  minval=-bound, maxval=bound)
        if bias:
            b_ih = jax.random.uniform(k3, (hidden_size,),
                                      minval=-bound, maxval=bound)
            b_hh = jax.random.uniform(k4, (hidden_size,),
                                      minval=-bound, maxval=bound)
        else:
            b_ih = jnp.zeros((hidden_size,), jnp.float32)
            b_hh = jnp.zeros((hidden_size,), jnp.float32)
        weights.append({
            "w_ih_t": jnp.asarray(w_ih.T, jnp.float32),             # (in, H)
            "w_hh_t": jnp.asarray(w_hh.T, jnp.float32),             # (H, H)
            "b": jnp.asarray((b_ih + b_hh)[None, :], jnp.float32),  # (1, H)
        })
    return weights


if __name__ == "__main__":
    params = {
        "input_size": 16,
        "hidden_size": 32,
        "seq_length": 8,
        "bias": True,
        "act_type": "tanh",
        "num_rec_layers": 2,
    }
    batch = 2

    key = jax.random.PRNGKey(0)
    key, kx = jax.random.split(key)
    x = jax.random.normal(
        kx, (batch, params["seq_length"], params["input_size"]), jnp.float32)

    weights = init_params(key, params["input_size"], params["hidden_size"],
                          params["num_rec_layers"], params["bias"])

    fwd = jax.jit(many_to_many_forward,
                  static_argnames=("act_type", "compute_dtype",
                                   "num_batch_blocks"))

    ref = _reference(x, weights, params["act_type"])

    # Validation path: f32 matmuls (close to torch.nn.RNN numerics; note the
    # MXU's default f32 path is not bit-exact).
    out_f32 = jax.block_until_ready(
        fwd(x, weights, act_type=params["act_type"],
            compute_dtype=jnp.float32))
    assert out_f32.shape == (batch, params["seq_length"],
                             params["hidden_size"])
    assert jnp.allclose(out_f32, ref, atol=1e-5, rtol=1e-5), "f32 mismatch"

    # Perf path: bf16 MXU operands with f32 accumulation, f32 hidden state.
    out_bf16 = jax.block_until_ready(
        fwd(x, weights, act_type=params["act_type"]))
    assert out_bf16.shape == (batch, params["seq_length"],
                              params["hidden_size"])
    assert jnp.allclose(out_bf16, ref, atol=5e-2, rtol=5e-2), "bf16 mismatch"

    print("KERNEL_OK")
</pallas_src>

<mosaic_0001>
module attributes {stable_mosaic.version = 11 : i64} {
  func.func @_fused_rnn_kernel(%arg0: i32, %arg1: memref<2x8x16xf32, #tpu.memory_space<vmem>>, %arg2: memref<16x32xf32, #tpu.memory_space<vmem>>, %arg3: memref<32x32xf32, #tpu.memory_space<vmem>>, %arg4: memref<1x32xf32, #tpu.memory_space<vmem>>, %arg5: memref<32x32xf32, #tpu.memory_space<vmem>>, %arg6: memref<32x32xf32, #tpu.memory_space<vmem>>, %arg7: memref<1x32xf32, #tpu.memory_space<vmem>>, %arg8: memref<2x8x32xf32, #tpu.memory_space<vmem>>) attributes {dimension_semantics = [#tpu.dimension_semantics<parallel>], iteration_bounds = array<i64: 1>, scalar_prefetch = 0 : i64, scratch_operands = 0 : i64, tpu.core_type = #tpu.core_type<tc>, window_params = [{transform_indices = @transform_0, window_bounds = array<i64: 2, 8, 16>}, {pipeline_mode = #tpu.pipeline_mode<synchronous>, transform_indices = @transform_1, window_bounds = array<i64: 16, 32>}, {pipeline_mode = #tpu.pipeline_mode<synchronous>, transform_indices = @transform_2, window_bounds = array<i64: 32, 32>}, {pipeline_mode = #tpu.pipeline_mode<synchronous>, transform_indices = @transform_3, window_bounds = array<i64: 1, 32>}, {pipeline_mode = #tpu.pipeline_mode<synchronous>, transform_indices = @transform_4, window_bounds = array<i64: 32, 32>}, {pipeline_mode = #tpu.pipeline_mode<synchronous>, transform_indices = @transform_5, window_bounds = array<i64: 32, 32>}, {pipeline_mode = #tpu.pipeline_mode<synchronous>, transform_indices = @transform_6, window_bounds = array<i64: 1, 32>}, {transform_indices = @transform_7, window_bounds = array<i64: 2, 8, 32>}]} {
    %c0 = arith.constant 0 : index
    %c0_0 = arith.constant 0 : index
    %c0_1 = arith.constant 0 : index
    %0 = vector.load %arg1[%c0, %c0_0, %c0_1] : memref<2x8x16xf32, #tpu.memory_space<vmem>>, vector<2x8x16xf32>
    %c0_2 = arith.constant 0 : index
    %c0_3 = arith.constant 0 : index
    %1 = vector.load %arg2[%c0_2, %c0_3] : memref<16x32xf32, #tpu.memory_space<vmem>>, vector<16x32xf32>
    %c0_4 = arith.constant 0 : index
    %c0_5 = arith.constant 0 : index
    %2 = vector.load %arg3[%c0_4, %c0_5] : memref<32x32xf32, #tpu.memory_space<vmem>>, vector<32x32xf32>
    %c0_6 = arith.constant 0 : index
    %c0_7 = arith.constant 0 : index
    %3 = vector.load %arg4[%c0_6, %c0_7] : memref<1x32xf32, #tpu.memory_space<vmem>>, vector<1x32xf32>
    %cst = arith.constant dense<0.000000e+00> : vector<2x8x32xf32>
    %4 = tpu.matmul %0, %1, %cst {dimension_numbers = #tpu.dot_dimension_numbers<[2], [0], [0, 1], [1], [0, 0, 0, 1, 1, 1], [], []>} : vector<2x8x16xf32>, vector<16x32xf32>, vector<2x8x32xf32> -> vector<2x8x32xf32>
    %5 = vector.shape_cast %3 : vector<1x32xf32> to vector<1x1x32xf32>
    %6 = vector.broadcast %5 : vector<1x1x32xf32> to vector<2x8x32xf32>
    %7 = arith.addf %4, %6 : vector<2x8x32xf32>
    %cst_8 = arith.constant 0.000000e+00 : f32
    %8 = vector.broadcast %cst_8 : f32 to vector<2x32xf32>
    %9 = vector.extract_strided_slice %7 {offsets = [0, 0, 0], sizes = [2, 1, 32], strides = [1, 1, 1]} : vector<2x8x32xf32> to vector<2x1x32xf32>
    %10 = vector.shape_cast %9 : vector<2x1x32xf32> to vector<2x32xf32>
    %cst_9 = arith.constant dense<0.000000e+00> : vector<2x32xf32>
    %11 = tpu.matmul %8, %2, %cst_9 {dimension_numbers = #tpu.dot_dimension_numbers<[1], [0], [0], [1], [0, 0, 1, 1], [], []>} : vector<2x32xf32>, vector<32x32xf32>, vector<2x32xf32> -> vector<2x32xf32>
    %12 = arith.addf %10, %11 : vector<2x32xf32>
    %13 = math.tanh %12 : vector<2x32xf32>
    %c0_10 = arith.constant 0 : index
    %c0_11 = arith.constant 0 : index
    %c0_12 = arith.constant 0 : index
    %14 = vector.load %arg8[%c0_10, %c0_11, %c0_12] : memref<2x8x32xf32, #tpu.memory_space<vmem>>, vector<2x1x32xf32>
    %15 = vector.shape_cast %14 : vector<2x1x32xf32> to vector<2x32xf32>
    %16 = vector.shape_cast %13 : vector<2x32xf32> to vector<2x1x32xf32>
    tpu.vector_store %arg8[%c0_10, %c0_11, %c0_12], %16 {strides = array<i32>} : memref<2x8x32xf32, #tpu.memory_space<vmem>>, vector<2x1x32xf32>,
    %17 = vector.extract_strided_slice %7 {offsets = [0, 1, 0], sizes = [2, 1, 32], strides = [1, 1, 1]} : vector<2x8x32xf32> to vector<2x1x32xf32>
    %18 = vector.shape_cast %17 : vector<2x1x32xf32> to vector<2x32xf32>
    %cst_13 = arith.constant dense<0.000000e+00> : vector<2x32xf32>
    %19 = tpu.matmul %13, %2, %cst_13 {dimension_numbers = #tpu.dot_dimension_numbers<[1], [0], [0], [1], [0, 0, 1, 1], [], []>} : vector<2x32xf32>, vector<32x32xf32>, vector<2x32xf32> -> vector<2x32xf32>
    %20 = arith.addf %18, %19 : vector<2x32xf32>
    %21 = math.tanh %20 : vector<2x32xf32>
    %c0_14 = arith.constant 0 : index
    %c1 = arith.constant 1 : index
    %c0_15 = arith.constant 0 : index
    %22 = vector.load %arg8[%c0_14, %c1, %c0_15] : memref<2x8x32xf32, #tpu.memory_space<vmem>>, vector<2x1x32xf32>
    %23 = vector.shape_cast %22 : vector<2x1x32xf32> to vector<2x32xf32>
    %24 = vector.shape_cast %21 : vector<2x32xf32> to vector<2x1x32xf32>
    tpu.vector_store %arg8[%c0_14, %c1, %c0_15], %24 {strides = array<i32>} : memref<2x8x32xf32, #tpu.memory_space<vmem>>, vector<2x1x32xf32>,
    %25 = vector.extract_strided_slice %7 {offsets = [0, 2, 0], sizes = [2, 1, 32], strides = [1, 1, 1]} : vector<2x8x32xf32> to vector<2x1x32xf32>
    %26 = vector.shape_cast %25 : vector<2x1x32xf32> to vector<2x32xf32>
    %cst_16 = arith.constant dense<0.000000e+00> : vector<2x32xf32>
    %27 = tpu.matmul %21, %2, %cst_16 {dimension_numbers = #tpu.dot_dimension_numbers<[1], [0], [0], [1], [0, 0, 1, 1], [], []>} : vector<2x32xf32>, vector<32x32xf32>, vector<2x32xf32> -> vector<2x32xf32>
    %28 = arith.addf %26, %27 : vector<2x32xf32>
    %29 = math.tanh %28 : vector<2x32xf32>
    %c0_17 = arith.constant 0 : index
    %c2 = arith.constant 2 : index
    %c0_18 = arith.constant 0 : index
    %30 = vector.load %arg8[%c0_17, %c2, %c0_18] : memref<2x8x32xf32, #tpu.memory_space<vmem>>, vector<2x1x32xf32>
    %31 = vector.shape_cast %30 : vector<2x1x32xf32> to vector<2x32xf32>
    %32 = vector.shape_cast %29 : vector<2x32xf32> to vector<2x1x32xf32>
    tpu.vector_store %arg8[%c0_17, %c2, %c0_18], %32 {strides = array<i32>} : memref<2x8x32xf32, #tpu.memory_space<vmem>>, vector<2x1x32xf32>,
    %33 = vector.extract_strided_slice %7 {offsets = [0, 3, 0], sizes = [2, 1, 32], strides = [1, 1, 1]} : vector<2x8x32xf32> to vector<2x1x32xf32>
    %34 = vector.shape_cast %33 : vector<2x1x32xf32> to vector<2x32xf32>
    %cst_19 = arith.constant dense<0.000000e+00> : vector<2x32xf32>
    %35 = tpu.matmul %29, %2, %cst_19 {dimension_numbers = #tpu.dot_dimension_numbers<[1], [0], [0], [1], [0, 0, 1, 1], [], []>} : vector<2x32xf32>, vector<32x32xf32>, vector<2x32xf32> -> vector<2x32xf32>
    %36 = arith.addf %34, %35 : vector<2x32xf32>
    %37 = math.tanh %36 : vector<2x32xf32>
    %c0_20 = arith.constant 0 : index
    %c3 = arith.constant 3 : index
    %c0_21 = arith.constant 0 : index
    %38 = vector.load %arg8[%c0_20, %c3, %c0_21] : memref<2x8x32xf32, #tpu.memory_space<vmem>>, vector<2x1x32xf32>
    %39 = vector.shape_cast %38 : vector<2x1x32xf32> to vector<2x32xf32>
    %40 = vector.shape_cast %37 : vector<2x32xf32> to vector<2x1x32xf32>
    tpu.vector_store %arg8[%c0_20, %c3, %c0_21], %40 {strides = array<i32>} : memref<2x8x32xf32, #tpu.memory_space<vmem>>, vector<2x1x32xf32>,
    %41 = vector.extract_strided_slice %7 {offsets = [0, 4, 0], sizes = [2, 1, 32], strides = [1, 1, 1]} : vector<2x8x32xf32> to vector<2x1x32xf32>
    %42 = vector.shape_cast %41 : vector<2x1x32xf32> to vector<2x32xf32>
    %cst_22 = arith.constant dense<0.000000e+00> : vector<2x32xf32>
    %43 = tpu.matmul %37, %2, %cst_22 {dimension_numbers = #tpu.dot_dimension_numbers<[1], [0], [0], [1], [0, 0, 1, 1], [], []>} : vector<2x32xf32>, vector<32x32xf32>, vector<2x32xf32> -> vector<2x32xf32>
    %44 = arith.addf %42, %43 : vector<2x32xf32>
    %45 = math.tanh %44 : vector<2x32xf32>
    %c0_23 = arith.constant 0 : index
    %c4 = arith.constant 4 : index
    %c0_24 = arith.constant 0 : index
    %46 = vector.load %arg8[%c0_23, %c4, %c0_24] : memref<2x8x32xf32, #tpu.memory_space<vmem>>, vector<2x1x32xf32>
    %47 = vector.shape_cast %46 : vector<2x1x32xf32> to vector<2x32xf32>
    %48 = vector.shape_cast %45 : vector<2x32xf32> to vector<2x1x32xf32>
    tpu.vector_store %arg8[%c0_23, %c4, %c0_24], %48 {strides = array<i32>} : memref<2x8x32xf32, #tpu.memory_space<vmem>>, vector<2x1x32xf32>,
    %49 = vector.extract_strided_slice %7 {offsets = [0, 5, 0], sizes = [2, 1, 32], strides = [1, 1, 1]} : vector<2x8x32xf32> to vector<2x1x32xf32>
    %50 = vector.shape_cast %49 : vector<2x1x32xf32> to vector<2x32xf32>
    %cst_25 = arith.constant dense<0.000000e+00> : vector<2x32xf32>
    %51 = tpu.matmul %45, %2, %cst_25 {dimension_numbers = #tpu.dot_dimension_numbers<[1], [0], [0], [1], [0, 0, 1, 1], [], []>} : vector<2x32xf32>, vector<32x32xf32>, vector<2x32xf32> -> vector<2x32xf32>
    %52 = arith.addf %50, %51 : vector<2x32xf32>
    %53 = math.tanh %52 : vector<2x32xf32>
    %c0_26 = arith.constant 0 : index
    %c5 = arith.constant 5 : index
    %c0_27 = arith.constant 0 : index
    %54 = vector.load %arg8[%c0_26, %c5, %c0_27] : memref<2x8x32xf32, #tpu.memory_space<vmem>>, vector<2x1x32xf32>
    %55 = vector.shape_cast %54 : vector<2x1x32xf32> to vector<2x32xf32>
    %56 = vector.shape_cast %53 : vector<2x32xf32> to vector<2x1x32xf32>
    tpu.vector_store %arg8[%c0_26, %c5, %c0_27], %56 {strides = array<i32>} : memref<2x8x32xf32, #tpu.memory_space<vmem>>, vector<2x1x32xf32>,
    %57 = vector.extract_strided_slice %7 {offsets = [0, 6, 0], sizes = [2, 1, 32], strides = [1, 1, 1]} : vector<2x8x32xf32> to vector<2x1x32xf32>
    %58 = vector.shape_cast %57 : vector<2x1x32xf32> to vector<2x32xf32>
    %cst_28 = arith.constant dense<0.000000e+00> : vector<2x32xf32>
    %59 = tpu.matmul %53, %2, %cst_28 {dimension_numbers = #tpu.dot_dimension_numbers<[1], [0], [0], [1], [0, 0, 1, 1], [], []>} : vector<2x32xf32>, vector<32x32xf32>, vector<2x32xf32> -> vector<2x32xf32>
    %60 = arith.addf %58, %59 : vector<2x32xf32>
    %61 = math.tanh %60 : vector<2x32xf32>
    %c0_29 = arith.constant 0 : index
    %c6 = arith.constant 6 : index
    %c0_30 = arith.constant 0 : index
    %62 = vector.load %arg8[%c0_29, %c6, %c0_30] : memref<2x8x32xf32, #tpu.memory_space<vmem>>, vector<2x1x32xf32>
    %63 = vector.shape_cast %62 : vector<2x1x32xf32> to vector<2x32xf32>
    %64 = vector.shape_cast %61 : vector<2x32xf32> to vector<2x1x32xf32>
    tpu.vector_store %arg8[%c0_29, %c6, %c0_30], %64 {strides = array<i32>} : memref<2x8x32xf32, #tpu.memory_space<vmem>>, vector<2x1x32xf32>,
    %65 = vector.extract_strided_slice %7 {offsets = [0, 7, 0], sizes = [2, 1, 32], strides = [1, 1, 1]} : vector<2x8x32xf32> to vector<2x1x32xf32>
    %66 = vector.shape_cast %65 : vector<2x1x32xf32> to vector<2x32xf32>
    %cst_31 = arith.constant dense<0.000000e+00> : vector<2x32xf32>
    %67 = tpu.matmul %61, %2, %cst_31 {dimension_numbers = #tpu.dot_dimension_numbers<[1], [0], [0], [1], [0, 0, 1, 1], [], []>} : vector<2x32xf32>, vector<32x32xf32>, vector<2x32xf32> -> vector<2x32xf32>
    %68 = arith.addf %66, %67 : vector<2x32xf32>
    %69 = math.tanh %68 : vector<2x32xf32>
    %c0_32 = arith.constant 0 : index
    %c7 = arith.constant 7 : index
    %c0_33 = arith.constant 0 : index
    %70 = vector.load %arg8[%c0_32, %c7, %c0_33] : memref<2x8x32xf32, #tpu.memory_space<vmem>>, vector<2x1x32xf32>
    %71 = vector.shape_cast %70 : vector<2x1x32xf32> to vector<2x32xf32>
    %72 = vector.shape_cast %69 : vector<2x32xf32> to vector<2x1x32xf32>
    tpu.vector_store %arg8[%c0_32, %c7, %c0_33], %72 {strides = array<i32>} : memref<2x8x32xf32, #tpu.memory_space<vmem>>, vector<2x1x32xf32>,
    %c0_34 = arith.constant 0 : index
    %c0_35 = arith.constant 0 : index
    %c0_36 = arith.constant 0 : index
    %73 = vector.load %arg8[%c0_34, %c0_35, %c0_36] : memref<2x8x32xf32, #tpu.memory_space<vmem>>, vector<2x8x32xf32>
    %c0_37 = arith.constant 0 : index
    %c0_38 = arith.constant 0 : index
    %74 = vector.load %arg5[%c0_37, %c0_38] : memref<32x32xf32, #tpu.memory_space<vmem>>, vector<32x32xf32>
    %c0_39 = arith.constant 0 : index
    %c0_40 = arith.constant 0 : index
    %75 = vector.load %arg6[%c0_39, %c0_40] : memref<32x32xf32, #tpu.memory_space<vmem>>, vector<32x32xf32>
    %c0_41 = arith.constant 0 : index
    %c0_42 = arith.constant 0 : index
    %76 = vector.load %arg7[%c0_41, %c0_42] : memref<1x32xf32, #tpu.memory_space<vmem>>, vector<1x32xf32>
    %cst_43 = arith.constant dense<0.000000e+00> : vector<2x8x32xf32>
    %77 = tpu.matmul %73, %74, %cst_43 {dimension_numbers = #tpu.dot_dimension_numbers<[2], [0], [0, 1], [1], [0, 0, 0, 1, 1, 1], [], []>} : vector<2x8x32xf32>, vector<32x32xf32>, vector<2x8x32xf32> -> vector<2x8x32xf32>
    %78 = vector.shape_cast %76 : vector<1x32xf32> to vector<1x1x32xf32>
    %79 = vector.broadcast %78 : vector<1x1x32xf32> to vector<2x8x32xf32>
    %80 = arith.addf %77, %79 : vector<2x8x32xf32>
    %cst_44 = arith.constant 0.000000e+00 : f32
    %81 = vector.broadcast %cst_44 : f32 to vector<2x32xf32>
    %82 = vector.extract_strided_slice %80 {offsets = [0, 0, 0], sizes = [2, 1, 32], strides = [1, 1, 1]} : vector<2x8x32xf32> to vector<2x1x32xf32>
    %83 = vector.shape_cast %82 : vector<2x1x32xf32> to vector<2x32xf32>
    %cst_45 = arith.constant dense<0.000000e+00> : vector<2x32xf32>
    %84 = tpu.matmul %81, %75, %cst_45 {dimension_numbers = #tpu.dot_dimension_numbers<[1], [0], [0], [1], [0, 0, 1, 1], [], []>} : vector<2x32xf32>, vector<32x32xf32>, vector<2x32xf32> -> vector<2x32xf32>
    %85 = arith.addf %83, %84 : vector<2x32xf32>
    %86 = math.tanh %85 : vector<2x32xf32>
    %c0_46 = arith.constant 0 : index
    %c0_47 = arith.constant 0 : index
    %c0_48 = arith.constant 0 : index
    %87 = vector.load %arg8[%c0_46, %c0_47, %c0_48] : memref<2x8x32xf32, #tpu.memory_space<vmem>>, vector<2x1x32xf32>
    %88 = vector.shape_cast %87 : vector<2x1x32xf32> to vector<2x32xf32>
    %89 = vector.shape_cast %86 : vector<2x32xf32> to vector<2x1x32xf32>
    tpu.vector_store %arg8[%c0_46, %c0_47, %c0_48], %89 {strides = array<i32>} : memref<2x8x32xf32, #tpu.memory_space<vmem>>, vector<2x1x32xf32>,
    %90 = vector.extract_strided_slice %80 {offsets = [0, 1, 0], sizes = [2, 1, 32], strides = [1, 1, 1]} : vector<2x8x32xf32> to vector<2x1x32xf32>
    %91 = vector.shape_cast %90 : vector<2x1x32xf32> to vector<2x32xf32>
    %cst_49 = arith.constant dense<0.000000e+00> : vector<2x32xf32>
    %92 = tpu.matmul %86, %75, %cst_49 {dimension_numbers = #tpu.dot_dimension_numbers<[1], [0], [0], [1], [0, 0, 1, 1], [], []>} : vector<2x32xf32>, vector<32x32xf32>, vector<2x32xf32> -> vector<2x32xf32>
    %93 = arith.addf %91, %92 : vector<2x32xf32>
    %94 = math.tanh %93 : vector<2x32xf32>
    %c0_50 = arith.constant 0 : index
    %c1_51 = arith.constant 1 : index
    %c0_52 = arith.constant 0 : index
    %95 = vector.load %arg8[%c0_50, %c1_51, %c0_52] : memref<2x8x32xf32, #tpu.memory_space<vmem>>, vector<2x1x32xf32>
    %96 = vector.shape_cast %95 : vector<2x1x32xf32> to vector<2x32xf32>
    %97 = vector.shape_cast %94 : vector<2x32xf32> to vector<2x1x32xf32>
    tpu.vector_store %arg8[%c0_50, %c1_51, %c0_52], %97 {strides = array<i32>} : memref<2x8x32xf32, #tpu.memory_space<vmem>>, vector<2x1x32xf32>,
    %98 = vector.extract_strided_slice %80 {offsets = [0, 2, 0], sizes = [2, 1, 32], strides = [1, 1, 1]} : vector<2x8x32xf32> to vector<2x1x32xf32>
    %99 = vector.shape_cast %98 : vector<2x1x32xf32> to vector<2x32xf32>
    %cst_53 = arith.constant dense<0.000000e+00> : vector<2x32xf32>
    %100 = tpu.matmul %94, %75, %cst_53 {dimension_numbers = #tpu.dot_dimension_numbers<[1], [0], [0], [1], [0, 0, 1, 1], [], []>} : vector<2x32xf32>, vector<32x32xf32>, vector<2x32xf32> -> vector<2x32xf32>
    %101 = arith.addf %99, %100 : vector<2x32xf32>
    %102 = math.tanh %101 : vector<2x32xf32>
    %c0_54 = arith.constant 0 : index
    %c2_55 = arith.constant 2 : index
    %c0_56 = arith.constant 0 : index
    %103 = vector.load %arg8[%c0_54, %c2_55, %c0_56] : memref<2x8x32xf32, #tpu.memory_space<vmem>>, vector<2x1x32xf32>
    %104 = vector.shape_cast %103 : vector<2x1x32xf32> to vector<2x32xf32>
    %105 = vector.shape_cast %102 : vector<2x32xf32> to vector<2x1x32xf32>
    tpu.vector_store %arg8[%c0_54, %c2_55, %c0_56], %105 {strides = array<i32>} : memref<2x8x32xf32, #tpu.memory_space<vmem>>, vector<2x1x32xf32>,
    %106 = vector.extract_strided_slice %80 {offsets = [0, 3, 0], sizes = [2, 1, 32], strides = [1, 1, 1]} : vector<2x8x32xf32> to vector<2x1x32xf32>
    %107 = vector.shape_cast %106 : vector<2x1x32xf32> to vector<2x32xf32>
    %cst_57 = arith.constant dense<0.000000e+00> : vector<2x32xf32>
    %108 = tpu.matmul %102, %75, %cst_57 {dimension_numbers = #tpu.dot_dimension_numbers<[1], [0], [0], [1], [0, 0, 1, 1], [], []>} : vector<2x32xf32>, vector<32x32xf32>, vector<2x32xf32> -> vector<2x32xf32>
    %109 = arith.addf %107, %108 : vector<2x32xf32>
    %110 = math.tanh %109 : vector<2x32xf32>
    %c0_58 = arith.constant 0 : index
    %c3_59 = arith.constant 3 : index
    %c0_60 = arith.constant 0 : index
    %111 = vector.load %arg8[%c0_58, %c3_59, %c0_60] : memref<2x8x32xf32, #tpu.memory_space<vmem>>, vector<2x1x32xf32>
    %112 = vector.shape_cast %111 : vector<2x1x32xf32> to vector<2x32xf32>
    %113 = vector.shape_cast %110 : vector<2x32xf32> to vector<2x1x32xf32>
    tpu.vector_store %arg8[%c0_58, %c3_59, %c0_60], %113 {strides = array<i32>} : memref<2x8x32xf32, #tpu.memory_space<vmem>>, vector<2x1x32xf32>,
    %114 = vector.extract_strided_slice %80 {offsets = [0, 4, 0], sizes = [2, 1, 32], strides = [1, 1, 1]} : vector<2x8x32xf32> to vector<2x1x32xf32>
    %115 = vector.shape_cast %114 : vector<2x1x32xf32> to vector<2x32xf32>
    %cst_61 = arith.constant dense<0.000000e+00> : vector<2x32xf32>
    %116 = tpu.matmul %110, %75, %cst_61 {dimension_numbers = #tpu.dot_dimension_numbers<[1], [0], [0], [1], [0, 0, 1, 1], [], []>} : vector<2x32xf32>, vector<32x32xf32>, vector<2x32xf32> -> vector<2x32xf32>
    %117 = arith.addf %115, %116 : vector<2x32xf32>
    %118 = math.tanh %117 : vector<2x32xf32>
    %c0_62 = arith.constant 0 : index
    %c4_63 = arith.constant 4 : index
    %c0_64 = arith.constant 0 : index
    %119 = vector.load %arg8[%c0_62, %c4_63, %c0_64] : memref<2x8x32xf32, #tpu.memory_space<vmem>>, vector<2x1x32xf32>
    %120 = vector.shape_cast %119 : vector<2x1x32xf32> to vector<2x32xf32>
    %121 = vector.shape_cast %118 : vector<2x32xf32> to vector<2x1x32xf32>
    tpu.vector_store %arg8[%c0_62, %c4_63, %c0_64], %121 {strides = array<i32>} : memref<2x8x32xf32, #tpu.memory_space<vmem>>, vector<2x1x32xf32>,
    %122 = vector.extract_strided_slice %80 {offsets = [0, 5, 0], sizes = [2, 1, 32], strides = [1, 1, 1]} : vector<2x8x32xf32> to vector<2x1x32xf32>
    %123 = vector.shape_cast %122 : vector<2x1x32xf32> to vector<2x32xf32>
    %cst_65 = arith.constant dense<0.000000e+00> : vector<2x32xf32>
    %124 = tpu.matmul %118, %75, %cst_65 {dimension_numbers = #tpu.dot_dimension_numbers<[1], [0], [0], [1], [0, 0, 1, 1], [], []>} : vector<2x32xf32>, vector<32x32xf32>, vector<2x32xf32> -> vector<2x32xf32>
    %125 = arith.addf %123, %124 : vector<2x32xf32>
    %126 = math.tanh %125 : vector<2x32xf32>
    %c0_66 = arith.constant 0 : index
    %c5_67 = arith.constant 5 : index
    %c0_68 = arith.constant 0 : index
    %127 = vector.load %arg8[%c0_66, %c5_67, %c0_68] : memref<2x8x32xf32, #tpu.memory_space<vmem>>, vector<2x1x32xf32>
    %128 = vector.shape_cast %127 : vector<2x1x32xf32> to vector<2x32xf32>
    %129 = vector.shape_cast %126 : vector<2x32xf32> to vector<2x1x32xf32>
    tpu.vector_store %arg8[%c0_66, %c5_67, %c0_68], %129 {strides = array<i32>} : memref<2x8x32xf32, #tpu.memory_space<vmem>>, vector<2x1x32xf32>,
    %130 = vector.extract_strided_slice %80 {offsets = [0, 6, 0], sizes = [2, 1, 32], strides = [1, 1, 1]} : vector<2x8x32xf32> to vector<2x1x32xf32>
    %131 = vector.shape_cast %130 : vector<2x1x32xf32> to vector<2x32xf32>
    %cst_69 = arith.constant dense<0.000000e+00> : vector<2x32xf32>
    %132 = tpu.matmul %126, %75, %cst_69 {dimension_numbers = #tpu.dot_dimension_numbers<[1], [0], [0], [1], [0, 0, 1, 1], [], []>} : vector<2x32xf32>, vector<32x32xf32>, vector<2x32xf32> -> vector<2x32xf32>
    %133 = arith.addf %131, %132 : vector<2x32xf32>
    %134 = math.tanh %133 : vector<2x32xf32>
    %c0_70 = arith.constant 0 : index
    %c6_71 = arith.constant 6 : index
    %c0_72 = arith.constant 0 : index
    %135 = vector.load %arg8[%c0_70, %c6_71, %c0_72] : memref<2x8x32xf32, #tpu.memory_space<vmem>>, vector<2x1x32xf32>
    %136 = vector.shape_cast %135 : vector<2x1x32xf32> to vector<2x32xf32>
    %137 = vector.shape_cast %134 : vector<2x32xf32> to vector<2x1x32xf32>
    tpu.vector_store %arg8[%c0_70, %c6_71, %c0_72], %137 {strides = array<i32>} : memref<2x8x32xf32, #tpu.memory_space<vmem>>, vector<2x1x32xf32>,
    %138 = vector.extract_strided_slice %80 {offsets = [0, 7, 0], sizes = [2, 1, 32], strides = [1, 1, 1]} : vector<2x8x32xf32> to vector<2x1x32xf32>
    %139 = vector.shape_cast %138 : vector<2x1x32xf32> to vector<2x32xf32>
    %cst_73 = arith.constant dense<0.000000e+00> : vector<2x32xf32>
    %140 = tpu.matmul %134, %75, %cst_73 {dimension_numbers = #tpu.dot_dimension_numbers<[1], [0], [0], [1], [0, 0, 1, 1], [], []>} : vector<2x32xf32>, vector<32x32xf32>, vector<2x32xf32> -> vector<2x32xf32>
    %141 = arith.addf %139, %140 : vector<2x32xf32>
    %142 = math.tanh %141 : vector<2x32xf32>
    %c0_74 = arith.constant 0 : index
    %c7_75 = arith.constant 7 : index
    %c0_76 = arith.constant 0 : index
    %143 = vector.load %arg8[%c0_74, %c7_75, %c0_76] : memref<2x8x32xf32, #tpu.memory_space<vmem>>, vector<2x1x32xf32>
    %144 = vector.shape_cast %143 : vector<2x1x32xf32> to vector<2x32xf32>
    %145 = vector.shape_cast %142 : vector<2x32xf32> to vector<2x1x32xf32>
    tpu.vector_store %arg8[%c0_74, %c7_75, %c0_76], %145 {strides = array<i32>} : memref<2x8x32xf32, #tpu.memory_space<vmem>>, vector<2x1x32xf32>,
    return
  }
  func.func @transform_0(%arg0: i32) -> (i32, i32, i32) {
    %c0_i32 = arith.constant 0 : i32
    %c0_i32_0 = arith.constant 0 : i32
    %c0_i32_1 = arith.constant 0 : i32
    return %arg0, %c0_i32, %c0_i32_0 : i32, i32, i32
  }
  func.func @transform_1(%arg0: i32) -> (i32, i32) {
    %c0_i32 = arith.constant 0 : i32
    %c0_i32_0 = arith.constant 0 : i32
    %c0_i32_1 = arith.constant 0 : i32
    return %c0_i32, %c0_i32_0 : i32, i32
  }
  func.func @transform_2(%arg0: i32) -> (i32, i32) {
    %c0_i32 = arith.constant 0 : i32
    %c0_i32_0 = arith.constant 0 : i32
    %c0_i32_1 = arith.constant 0 : i32
    return %c0_i32, %c0_i32_0 : i32, i32
  }
  func.func @transform_3(%arg0: i32) -> (i32, i32) {
    %c0_i32 = arith.constant 0 : i32
    %c0_i32_0 = arith.constant 0 : i32
    %c0_i32_1 = arith.constant 0 : i32
    return %c0_i32, %c0_i32_0 : i32, i32
  }
  func.func @transform_4(%arg0: i32) -> (i32, i32) {
    %c0_i32 = arith.constant 0 : i32
    %c0_i32_0 = arith.constant 0 : i32
    %c0_i32_1 = arith.constant 0 : i32
    return %c0_i32, %c0_i32_0 : i32, i32
  }
  func.func @transform_5(%arg0: i32) -> (i32, i32) {
    %c0_i32 = arith.constant 0 : i32
    %c0_i32_0 = arith.constant 0 : i32
    %c0_i32_1 = arith.constant 0 : i32
    return %c0_i32, %c0_i32_0 : i32, i32
  }
  func.func @transform_6(%arg0: i32) -> (i32, i32) {
    %c0_i32 = arith.constant 0 : i32
    %c0_i32_0 = arith.constant 0 : i32
    %c0_i32_1 = arith.constant 0 : i32
    return %c0_i32, %c0_i32_0 : i32, i32
  }
  func.func @transform_7(%arg0: i32) -> (i32, i32, i32) {
    %c0_i32 = arith.constant 0 : i32
    %c0_i32_0 = arith.constant 0 : i32
    %c0_i32_1 = arith.constant 0 : i32
    return %arg0, %c0_i32, %c0_i32_0 : i32, i32, i32
  }
}

</mosaic_0001>

<bundles_post_ra>
// kernel: many_to_many_forward.1
= control target key start
LH: loop header
LB: loop body
LE: loop exit
PB: predicated region body
PF: predicated region fallthrough
CT: control target
= control target key end

     0   :  { %12 = vsyncpa [#allocation3], 0  ;;  %s2586_s0 = inlined_call_operand.hbm [shape: f32[2,8,16], index: 0, kind: input, shape index: {}]   ;;  %s2587_s1 = inlined_call_operand.hbm [shape: f32[16,32], index: 1, kind: input, shape index: {}]   ;;  %s2588_s2 = inlined_call_operand.hbm [shape: f32[32,32], index: 2, kind: input, shape index: {}]   ;;  %s2589_s3 = inlined_call_operand.vmem [shape: f32[1,32], index: 3, kind: input, shape index: {}]   ;;  %s2590_s4 = inlined_call_operand.hbm [shape: f32[32,32], index: 4, kind: input, shape index: {}]   ;;  %s2591_s5 = inlined_call_operand.hbm [shape: f32[32,32], index: 5, kind: input, shape index: {}]   ;;  %s2592_s6 = inlined_call_operand.vmem [shape: f32[1,32], index: 6, kind: input, shape index: {}]   ;;  %s2593_s7 = inlined_call_operand.hbm [shape: f32[2,8,32], index: 7, kind: output, shape index: {}]  }
   0x1   :  { %13 = vsyncpa [#allocation6], 0 }
   0x2   :  { %14 = vsyncpa [#allocation9], 0 }
   0x3   :  { %15 = vsyncpa [#allocation4], 0  ;;  %s2214_s24 = smov [#allocation5]   ;;  %s2215_s26 = smov [#allocation8]  }
   0x4   :  { %s33_s25 = sshll.u32 %s2214_s24, 4  ;;  %s59_s27 = sshll.u32 %s2215_s26, 4  ;;  %s34_s25 = int_to_ptr.vmem [resolvable:$true] %s33_s25  ;;  %s60_s27 = int_to_ptr.vmem [resolvable:$true] %s59_s27 }
   0x5   :  { %s2094_s28 = scalar_lea.vmem %s34_s25, 256  ;;  %p2099_p1 = scmp.lt.s32.totalorder %s34_s25, %s34_s25 }
   0x6   :  { %p2095_p0 = scmp.ne.s32.totalorder %s34_s25, %s2094_s28  ;;  %p2100_p2 = scmp.lt.s32.totalorder %s2094_s28, %s2094_s28 }
   0x8   :  { %p2101_p3 = por %p2100_p2, %p2099_p1 }
   0xa   :  { %p2102_p4 = pnand %p2101_p3, %p2095_p0 }
   0xc   :  { %2105 = shalt.err (!%p2102_p4)
}
   0xd   :  { %s2216_s29 = smov 128   ;;  %s2217_s30 = smov 8  }
   0xe   :  { %39 = dma.hbm_to_vmem [thread:$0]  %s2587_s1, 256, %s34_s25, [#allocation6], %s2216_s29, %s2216_s29, %s2217_s30  }
   0xf   :  { %s2114_s10 = scalar_lea.vmem %s60_s27, 512  ;;  %p2119_p6 = scmp.lt.s32.totalorder %s60_s27, %s60_s27 }
  0x10   :  { %p2115_p5 = scmp.ne.s32.totalorder %s60_s27, %s2114_s10  ;;  %p2120_p7 = scmp.lt.s32.totalorder %s2114_s10, %s2114_s10 }
  0x12   :  { %p2121_p8 = por %p2120_p7, %p2119_p6 }
  0x14   :  { %p2122_p9 = pnand %p2121_p8, %p2115_p5 }
  0x16   :  { %2125 = shalt.err (!%p2122_p9)
}
  0x17   :  { %65 = dma.hbm_to_vmem [thread:$0]  %s2590_s4, 512, %s60_s27, [#allocation9], %s2216_s29, %s2216_s29, %s2217_s30  }
  0x18   :  { %s2218_s13 = smov [#allocation2]   ;;  %s2219_s15 = smov [#allocation7]  }
  0x19   :  { %s21_s14 = sshll.u32 %s2218_s13, 4  ;;  %s45_s16 = sshll.u32 %s2219_s15, 4  ;;  %s22_s14 = int_to_ptr.vmem [resolvable:$true] %s21_s14  ;;  %s46_s16 = int_to_ptr.vmem [resolvable:$true] %s45_s16 }
  0x1a   :  { %s2134_s1 = scalar_lea.vmem %s22_s14, 256  ;;  %p2139_p11 = scmp.lt.s32.totalorder %s22_s14, %s22_s14 }
  0x1b   :  { %p2135_p10 = scmp.ne.s32.totalorder %s22_s14, %s2134_s1  ;;  %p2140_p12 = scmp.lt.s32.totalorder %s2134_s1, %s2134_s1 }
  0x1d   :  { %p2141_p13 = por %p2140_p12, %p2139_p11 }
  0x1f   :  { %p2142_p0 = pnand %p2141_p13, %p2135_p10 }
  0x21   :  { %2145 = shalt.err (!%p2142_p0)
}
  0x22   :  { %27 = dma.hbm_to_vmem [thread:$0]  %s2586_s0, 256, %s22_s14, [#allocation3], %s2216_s29, %s2216_s29, %s2217_s30  }
  0x23   :  { %s2154_s4 = scalar_lea.vmem %s46_s16, 512  ;;  %p2159_p2 = scmp.lt.s32.totalorder %s46_s16, %s46_s16 }
  0x24   :  { %p2155_p1 = scmp.ne.s32.totalorder %s46_s16, %s2154_s4  ;;  %p2160_p3 = scmp.lt.s32.totalorder %s2154_s4, %s2154_s4 }
  0x26   :  { %p2161_p4 = por %p2160_p3, %p2159_p2 }
  0x28   :  { %p2162_p5 = pnand %p2161_p4, %p2155_p1 }
  0x2a   :  { %2165 = shalt.err (!%p2162_p5)
}
  0x2b   :  { %51 = dma.hbm_to_vmem [thread:$0]  %s2588_s2, 512, %s46_s16, [#allocation6], %s2216_s29, %s2216_s29, %s2217_s30  }
  0x2c   :  { %s2220_s21 = smov [#allocation10]  }
  0x2d   :  { %s71_s22 = sshll.u32 %s2220_s21, 4  ;;  %s72_s22 = int_to_ptr.vmem [resolvable:$true] %s71_s22 }
  0x2e   :  { %s2174_s23 = scalar_lea.vmem %s72_s22, 512  ;;  %p2179_p7 = scmp.lt.s32.totalorder %s72_s22, %s72_s22 }
  0x2f   :  { %p2175_p6 = scmp.ne.s32.totalorder %s72_s22, %s2174_s23  ;;  %p2180_p8 = scmp.lt.s32.totalorder %s2174_s23, %s2174_s23 }
  0x31   :  { %p2181_p9 = por %p2180_p8, %p2179_p7 }
  0x33   :  { %p2182_p10 = pnand %p2181_p9, %p2175_p6 }
  0x35   :  { %2185 = shalt.err (!%p2182_p10)
}
  0x36   :  { %77 = dma.hbm_to_vmem [thread:$0]  %s2591_s5, 512, %s72_s22, [#allocation9], %s2216_s29, %s2216_s29, %s2217_s30  }
  0x37   :  { %2206 = dma.done.wait [#allocation3], 256  }
  0x38   :  { %2207 = vsyncadd [#allocation3], 4294967040 }
  0x39   :  { %2208 = dma.done.wait [#allocation6], 768  }
  0x3a   :  { %2209 = vsyncadd [#allocation6], 4294966528 }
  0x3b   :  { %2210 = dma.done.wait [#allocation9], 1024  }
  0x3c   :  { %2211 = vsyncadd [#allocation9], 4294966272  ;;  %v2221_v0 = vmov 0.0   ;;  %vm2222_vm0 = vmmov 0   ;;  %v98_v1 = vld [vmem:[#allocation5 + $0x8] sm:$0xff]  ;;  %v97_v3 = vld [vmem:[#allocation5] sm:$0xff] }
  0x3d   :  { %1825 = vmatprep.subr.mxu1 %v2221_v0  ;;  %1833 = vmatprep.mubr.msk.f32.mxu1 %vm2222_vm0, %v2221_v0  ;;  %v2297_v2 = vld [vmem:[#allocation7 + $0x18] sm:$0xff]  ;;  %v2300_v4 = vld [vmem:[#allocation7 + $0x10] sm:$0xff]  ;;  %v95_v5 = vld [vmem:[#allocation2] sm:$0xff]  ;;  %vm110_vm1 = vcmask 130048   ;;  %vm274_vm2 = vcmask 253952   ;;  %vm280_vm3 = vcmask 1041409  }
  0x3e   :  { %1818 = vmatprep.subr.mxu0 %v98_v1  ;;  %1826 = vmatpush3.msra.mxu1 %v2297_v2  ;;  %v96_v6 = vld [vmem:[#allocation2 + $0x8] sm:$0xff]  ;;  %v2307_v8 = vld [vmem:[#allocation7] sm:$0xff]  ;;  %vm192_vm4 = vcmask 261120   ;;  %vm362_vm5 = vcmask 254977   ;;  %vm450_vm6 = vcmask 256002   ;;  %vm539_vm7 = vcmask 257027  }
  0x3f   :  { %1819 = vmatpush3.msra.mxu0 %v98_v1  ;;  %1827 = vmatprep.subr.mxu1 %v2221_v0  ;;  %v2304_v7 = vld [vmem:[#allocation7 + $0x8] sm:$0xff]  ;;  %v1708_v10 = vld [vmem:[%s2589_s3] ss:$0 sm:$0xff]  ;;  %vm628_vm8 = vcmask 258052   ;;  %vm717_vm9 = vcmask 259077   ;;  %vm806_vm10 = vcmask 260102  }
  0x40   :  { %1820 = vmatprep.subr.mxu0 %v97_v3  ;;  %1828 = vmatpush3.msra.mxu1 %v2300_v4  ;;  %vm895_vm11 = vcmask 261127  }
  0x41   :  { %1821 = vmatpush3.msra.mxu0 %v97_v3  ;;  %1822 = vmatprep.mubr.msk.f32.mxu0 %vm110_vm1, %v95_v5 }
  0x42   :  { %1829 = vmatprep.subr.mxu1 %v2221_v0  ;;  %1823 = vmatmul.mubr.msk.f32.vlgmr.msra.gmra.mxu0 %vm110_vm1, %v96_v6 }
  0x43   :  { %1830 = vmatpush3.msra.mxu1 %v2304_v7  ;;  %1836 = vmatprep.subr.mxu0 %v2221_v0 }
  0x44   :  { %1831 = vmatprep.subr.mxu1 %v2221_v0  ;;  %1837 = vmatpush3.msra.mxu0 %v2297_v2 }
  0x45   :  { %1832 = vmatpush3.msra.mxu1 %v2307_v8  ;;  %1838 = vmatprep.subr.mxu0 %v2221_v0 }
  0x46   :  { %1834 = vmatmul.mubr.f32.vlgmr.msra.gmra.mxu1 %v2221_v0  ;;  %1839 = vmatpush3.msra.mxu0 %v2300_v4 }
  0x47   :  { %1840 = vmatprep.subr.mxu0 %v2221_v0  ;;  %1844 = vmatprep.mubr.msk.f32.mxu0 %vm2222_vm0, %v2221_v0 }
  0x48   :  { %1841 = vmatpush3.msra.mxu0 %v2304_v7  ;;  %1847 = vmatprep.subr.mxu1 %v2221_v0 }
  0x49   :  { %1842 = vmatprep.subr.mxu0 %v2221_v0  ;;  %1848 = vmatpush3.msra.mxu1 %v2297_v2 }
  0x4a   :  { %1843 = vmatpush3.msra.mxu0 %v2307_v8  ;;  %1849 = vmatprep.subr.mxu1 %v2221_v0 }
  0x4b   :  { %1850 = vmatpush3.msra.mxu1 %v2300_v4  ;;  %1855 = vmatprep.mubr.msk.f32.mxu1 %vm2222_vm0, %v2221_v0 }
  0x4c   :  { %1851 = vmatprep.subr.mxu1 %v2221_v0  ;;  %1858 = vmatprep.subr.mxu0 %v2221_v0 }
  0x4d   :  { %1852 = vmatpush3.msra.mxu1 %v2304_v7 }
  0x4e   :  { %1853 = vmatprep.subr.mxu1 %v2221_v0 }
  0x4f   :  { %1854 = vmatpush3.msra.mxu1 %v2307_v8 }
  0x50   :  { %1869 = vmatprep.subr.mxu1 %v2221_v0 }
 0x102   :  { %v1824_v9 = vpop.f32.mrf.mxu0 }
 0x103   :  { %v2338_v12 = vadd.f32 %v1824_v9, %v1708_v10 }
 0x104   :  { %v183_v11 = vpop.f32.mrf.mxu0 }
 0x105   :  { %v2340_v13 = vadd.f32 %v1708_v10, %v183_v11 }
 0x106   :  { %v262_v14 = vpop.f32.mrf.mxu1 }
 0x107   :  { %v267_v15 = vrot.slane %v262_v14, 1  ;;  %v270_v16 = vadd.f32 %v262_v14, %v2340_v13 }
 0x108   :  { %v1835_v17 = vpop.f32.mrf.mxu1 }
 0x109   :  { %v271_v18 = vadd.f32 %v267_v15, %v2338_v12  ;;  %2022 = vtanh.f32 %v270_v16 }
 0x10b   :  { %2024 = vtanh.f32 %v271_v18 }
 0x116   :  { %v2023_v19 = vpop.eup %2022 }
 0x117   :  { %275 = vst.msk [vmem:[#allocation11] sm:$0x1] %vm274_vm2, %v2023_v19 }
 0x118   :  { %v2025_v20 = vpop.eup %2024 }
 0x119   :  { %276 = vst.msk [vmem:[#allocation11 + $0x8] sm:$0x1] %vm274_vm2, %v2025_v20  ;;  %v279_v21 = vrot.slane %v2025_v20, 7 }
 0x11b   :  { %v281_v22 = vsel %vm280_vm3, %v279_v21, %v2023_v19 }
 0x11c   :  { %1845 = vmatmul.mubr.msk.f32.vlgmr.msra.gmra.mxu0 %vm192_vm4, %v281_v22 }
 0x11d   :  { %1859 = vmatpush3.msra.mxu0 %v2297_v2  ;;  %1866 = vmatprep.mubr.msk.f32.mxu0 %vm2222_vm0, %v2221_v0 }
 0x11e   :  { %1860 = vmatprep.subr.mxu0 %v2221_v0 }
 0x11f   :  { %1861 = vmatpush3.msra.mxu0 %v2300_v4 }
 0x120   :  { %1862 = vmatprep.subr.mxu0 %v2221_v0 }
 0x121   :  { %1863 = vmatpush3.msra.mxu0 %v2304_v7 }
 0x122   :  { %1864 = vmatprep.subr.mxu0 %v2221_v0 }
 0x123   :  { %1865 = vmatpush3.msra.mxu0 %v2307_v8 }
 0x124   :  { %1880 = vmatprep.subr.mxu0 %v2221_v0 }
 0x1dc   :  { %v350_v23 = vpop.f32.mrf.mxu0 }
 0x1dd   :  { %v355_v24 = vrot.slane %v350_v23, 7  ;;  %v359_v25 = vadd.f32 %v350_v23, %v2338_v12 }
 0x1de   :  { %v1846_v26 = vpop.f32.mrf.mxu0 }
 0x1df   :  { %v358_v27 = vadd.f32 %v355_v24, %v2340_v13  ;;  %2026 = vtanh.f32 %v359_v25  ;;  %v2435_v26 = vld [vmem:[#allocation10 + $0x18] sm:$0xff] }
 0x1e1   :  { %2028 = vtanh.f32 %v358_v27  ;;  %v903_v27 = vld [vmem:[#allocation8 + $0x18] sm:$0xff] }
 0x1ec   :  { %v2027_v28 = vpop.eup %2026 }
 0x1ed   :  { %364 = vst.msk [vmem:[#allocation11 + $0x8] sm:$0x2] %vm362_vm5, %v2027_v28 }
 0x1ee   :  { %v2029_v29 = vpop.eup %2028 }
 0x1ef   :  { %363 = vst.msk [vmem:[#allocation11] sm:$0x2] %vm362_vm5, %v2029_v29  ;;  %v367_v30 = vrot.slane %v2029_v29, 1  ;;  %v902_v29 = vld [vmem:[#allocation8 + $0x10] sm:$0xff] }
 0x1f1   :  { %v368_v31 = vsel %vm280_vm3, %v2027_v28, %v367_v30  ;;  %v2438_v28 = vld [vmem:[#allocation10 + $0x10] sm:$0xff]  ;;  %v2441_v30 = vld [vmem:[#allocation10 + $0x8] sm:$0xff] }
 0x1f2   :  { %1856 = vmatmul.mubr.msk.f32.vlgmr.msra.gmra.mxu1 %vm192_vm4, %v368_v31  ;;  %v901_v31 = vld [vmem:[#allocation8 + $0x8] sm:$0xff] }
 0x1f3   :  { %1870 = vmatpush3.msra.mxu1 %v2297_v2  ;;  %1877 = vmatprep.mubr.msk.f32.mxu1 %vm2222_vm0, %v2221_v0 }
 0x1f4   :  { %1871 = vmatprep.subr.mxu1 %v2221_v0 }
 0x1f5   :  { %1872 = vmatpush3.msra.mxu1 %v2300_v4 }
 0x1f6   :  { %1873 = vmatprep.subr.mxu1 %v2221_v0 }
 0x1f7   :  { %1874 = vmatpush3.msra.mxu1 %v2304_v7 }
 0x1f8   :  { %1875 = vmatprep.subr.mxu1 %v2221_v0 }
 0x1f9   :  { %1876 = vmatpush3.msra.mxu1 %v2307_v8 }
 0x1fa   :  { %1891 = vmatprep.subr.mxu1 %v2221_v0 }
 0x2b2   :  { %v437_v32 = vpop.f32.mrf.mxu1 }
 0x2b3   :  { %v442_v33 = vrot.slane %v437_v32, 6  ;;  %v443_v34 = vrot.slane %v437_v32, 7  ;;  %v2445_v32 = vld [vmem:[#allocation10] sm:$0xff] }
 0x2b4   :  { %v1857_v35 = vpop.f32.mrf.mxu1 }
 0x2b5   :  { %v446_v36 = vadd.f32 %v442_v33, %v2340_v13  ;;  %v447_v37 = vadd.f32 %v443_v34, %v2338_v12  ;;  %v900_v33 = vld [vmem:[#allocation8] sm:$0xff] }
 0x2b7   :  { %2030 = vtanh.f32 %v446_v36 }
 0x2b8   :  { %2032 = vtanh.f32 %v447_v37 }
 0x2c4   :  { %v2031_v38 = vpop.eup %2030 }
 0x2c5   :  { %v2033_v39 = vpop.eup %2032  ;;  %451 = vst.msk [vmem:[#allocation11] sm:$0x4] %vm450_vm6, %v2031_v38  ;;  %v455_v40 = vrot.slane %v2031_v38, 2 }
 0x2c6   :  { %452 = vst.msk [vmem:[#allocation11 + $0x8] sm:$0x4] %vm450_vm6, %v2033_v39  ;;  %v456_v41 = vrot.slane %v2033_v39, 1 }
 0x2c8   :  { %v457_v42 = vsel %vm280_vm3, %v456_v41, %v455_v40 }
 0x2c9   :  { %1867 = vmatmul.mubr.msk.f32.vlgmr.msra.gmra.mxu0 %vm192_vm4, %v457_v42 }
 0x2ca   :  { %1881 = vmatpush3.msra.mxu0 %v2297_v2  ;;  %1888 = vmatprep.mubr.msk.f32.mxu0 %vm2222_vm0, %v2221_v0 }
 0x2cb   :  { %1882 = vmatprep.subr.mxu0 %v2221_v0 }
 0x2cc   :  { %1883 = vmatpush3.msra.mxu0 %v2300_v4 }
 0x2cd   :  { %1884 = vmatprep.subr.mxu0 %v2221_v0 }
 0x2ce   :  { %1885 = vmatpush3.msra.mxu0 %v2304_v7 }
 0x2cf   :  { %1886 = vmatprep.subr.mxu0 %v2221_v0 }
 0x2d0   :  { %1887 = vmatpush3.msra.mxu0 %v2307_v8 }
 0x2d1   :  { %1902 = vmatprep.subr.mxu0 %v2221_v0 }
 0x389   :  { %v526_v43 = vpop.f32.mrf.mxu0 }
 0x38a   :  { %v531_v44 = vrot.slane %v526_v43, 5  ;;  %v532_v45 = vrot.slane %v526_v43, 6 }
 0x38b   :  { %v1868_v46 = vpop.f32.mrf.mxu0 }
 0x38c   :  { %v535_v47 = vadd.f32 %v531_v44, %v2340_v13  ;;  %v536_v48 = vadd.f32 %v532_v45, %v2338_v12  ;;  %v1718_v44 = vld [vmem:[%s2592_s6] ss:$0 sm:$0xff]  ;;  %s2223_s6 = smov [#allocation11]  }
 0x38d   :  { %s1694_s26 = sshll.u32 %s2223_s6, 4  ;;  %s1695_s26 = int_to_ptr.vmem [resolvable:$true] %s1694_s26 }
 0x38e   :  { %2034 = vtanh.f32 %v535_v47  ;;  %s2186_s27 = scalar_lea.vmem %s1695_s26, 256  ;;  %p2191_p12 = scmp.lt.s32.totalorder %s1695_s26, %s1695_s26 }
 0x38f   :  { %2036 = vtanh.f32 %v536_v48  ;;  %p2187_p11 = scmp.ne.s32.totalorder %s1695_s26, %s2186_s27  ;;  %p2192_p13 = scmp.lt.s32.totalorder %s2186_s27, %s2186_s27 }
 0x391   :  { %p2193_p0 = por %p2192_p13, %p2191_p12 }
 0x393   :  { %p2194_p1 = pnand %p2193_p0, %p2187_p11 }
 0x39b   :  { %v2035_v49 = vpop.eup %2034 }
 0x39c   :  { %v2037_v50 = vpop.eup %2036  ;;  %540 = vst.msk [vmem:[#allocation11] sm:$0x8] %vm539_vm7, %v2035_v49  ;;  %v544_v51 = vrot.slane %v2035_v49, 3 }
 0x39d   :  { %541 = vst.msk [vmem:[#allocation11 + $0x8] sm:$0x8] %vm539_vm7, %v2037_v50  ;;  %v545_v52 = vrot.slane %v2037_v50, 2 }
 0x39f   :  { %v546_v53 = vsel %vm280_vm3, %v545_v52, %v544_v51 }
 0x3a0   :  { %1878 = vmatmul.mubr.msk.f32.vlgmr.msra.gmra.mxu1 %vm192_vm4, %v546_v53 }
 0x3a1   :  { %1892 = vmatpush3.msra.mxu1 %v2297_v2  ;;  %1899 = vmatprep.mubr.msk.f32.mxu1 %vm2222_vm0, %v2221_v0 }
 0x3a2   :  { %1893 = vmatprep.subr.mxu1 %v2221_v0 }
 0x3a3   :  { %1894 = vmatpush3.msra.mxu1 %v2300_v4 }
 0x3a4   :  { %1895 = vmatprep.subr.mxu1 %v2221_v0 }
 0x3a5   :  { %1896 = vmatpush3.msra.mxu1 %v2304_v7 }
 0x3a6   :  { %1897 = vmatprep.subr.mxu1 %v2221_v0 }
 0x3a7   :  { %1898 = vmatpush3.msra.mxu1 %v2307_v8 }
 0x3a8   :  { %1913 = vmatprep.subr.mxu1 %v903_v27 }
 0x460   :  { %v615_v54 = vpop.f32.mrf.mxu1 }
 0x461   :  { %v620_v55 = vrot.slane %v615_v54, 4  ;;  %v621_v56 = vrot.slane %v615_v54, 5 }
 0x462   :  { %v1879_v57 = vpop.f32.mrf.mxu1 }
 0x463   :  { %v624_v58 = vadd.f32 %v620_v55, %v2340_v13  ;;  %v625_v59 = vadd.f32 %v621_v56, %v2338_v12 }
 0x465   :  { %2038 = vtanh.f32 %v624_v58 }
 0x466   :  { %2040 = vtanh.f32 %v625_v59 }
 0x472   :  { %v2039_v60 = vpop.eup %2038 }
 0x473   :  { %v2041_v61 = vpop.eup %2040  ;;  %629 = vst.msk [vmem:[#allocation11] sm:$0x10] %vm628_vm8, %v2039_v60  ;;  %v633_v62 = vrot.slane %v2039_v60, 4 }
 0x474   :  { %630 = vst.msk [vmem:[#allocation11 + $0x8] sm:$0x10] %vm628_vm8, %v2041_v61  ;;  %v634_v63 = vrot.slane %v2041_v61, 3 }
 0x476   :  { %v635_v1 = vsel %vm280_vm3, %v634_v63, %v633_v62 }
 0x477   :  { %1889 = vmatmul.mubr.msk.f32.vlgmr.msra.gmra.mxu0 %vm192_vm4, %v635_v1 }
 0x478   :  { %1903 = vmatpush3.msra.mxu0 %v2297_v2  ;;  %1910 = vmatprep.mubr.msk.f32.mxu0 %vm2222_vm0, %v2221_v0 }
 0x479   :  { %1904 = vmatprep.subr.mxu0 %v2221_v0 }
 0x47a   :  { %1905 = vmatpush3.msra.mxu0 %v2300_v4 }
 0x47b   :  { %1906 = vmatprep.subr.mxu0 %v2221_v0 }
 0x47c   :  { %1907 = vmatpush3.msra.mxu0 %v2304_v7 }
 0x47d   :  { %1908 = vmatprep.subr.mxu0 %v2221_v0 }
 0x47e   :  { %1909 = vmatpush3.msra.mxu0 %v2307_v8 }
 0x47f   :  { %1924 = vmatprep.subr.mxu0 %v2221_v0 }
 0x537   :  { %v704_v3 = vpop.f32.mrf.mxu0 }
 0x538   :  { %v709_v5 = vrot.slane %v704_v3, 3  ;;  %v710_v2 = vrot.slane %v704_v3, 4 }
 0x539   :  { %v1890_v6 = vpop.f32.mrf.mxu0 }
 0x53a   :  { %v713_v9 = vadd.f32 %v709_v5, %v2340_v13  ;;  %v714_v10 = vadd.f32 %v710_v2, %v2338_v12 }
 0x53c   :  { %2042 = vtanh.f32 %v713_v9 }
 0x53d   :  { %2044 = vtanh.f32 %v714_v10 }
 0x549   :  { %v2043_v4 = vpop.eup %2042 }
 0x54a   :  { %v2045_v11 = vpop.eup %2044  ;;  %718 = vst.msk [vmem:[#allocation11] sm:$0x20] %vm717_vm9, %v2043_v4  ;;  %v722_v7 = vrot.slane %v2043_v4, 5 }
 0x54b   :  { %719 = vst.msk [vmem:[#allocation11 + $0x8] sm:$0x20] %vm717_vm9, %v2045_v11  ;;  %v723_v8 = vrot.slane %v2045_v11, 4 }
 0x54d   :  { %v724_v14 = vsel %vm280_vm3, %v723_v8, %v722_v7 }
 0x54e   :  { %1900 = vmatmul.mubr.msk.f32.vlgmr.msra.gmra.mxu1 %vm192_vm4, %v724_v14 }
 0x54f   :  { %1914 = vmatpush3.msra.mxu1 %v903_v27 }
 0x550   :  { %1915 = vmatprep.subr.mxu1 %v902_v29 }
 0x551   :  { %1916 = vmatpush3.msra.mxu1 %v902_v29 }
 0x552   :  { %1917 = vmatprep.subr.mxu1 %v901_v31 }
 0x553   :  { %1918 = vmatpush3.msra.mxu1 %v901_v31 }
 0x554   :  { %1919 = vmatprep.subr.mxu1 %v900_v33 }
 0x555   :  { %1920 = vmatpush3.msra.mxu1 %v900_v33 }
 0x556   :  { %1935 = vmatprep.subr.mxu1 %v2221_v0 }
 0x60e   :  { %v793_v15 = vpop.f32.mrf.mxu1 }
 0x60f   :  { %v798_v16 = vrot.slane %v793_v15, 2  ;;  %v799_v17 = vrot.slane %v793_v15, 3 }
 0x610   :  { %v1901_v18 = vpop.f32.mrf.mxu1 }
 0x611   :  { %v802_v19 = vadd.f32 %v798_v16, %v2340_v13  ;;  %v803_v20 = vadd.f32 %v799_v17, %v2338_v12 }
 0x613   :  { %2046 = vtanh.f32 %v802_v19 }
 0x614   :  { %2048 = vtanh.f32 %v803_v20 }
 0x620   :  { %v2047_v21 = vpop.eup %2046 }
 0x621   :  { %v2049_v22 = vpop.eup %2048  ;;  %807 = vst.msk [vmem:[#allocation11] sm:$0x40] %vm806_vm10, %v2047_v21  ;;  %v811_v23 = vrot.slane %v2047_v21, 6 }
 0x622   :  { %808 = vst.msk [vmem:[#allocation11 + $0x8] sm:$0x40] %vm806_vm10, %v2049_v22  ;;  %v812_v24 = vrot.slane %v2049_v22, 5 }
 0x624   :  { %v813_v25 = vsel %vm280_vm3, %v812_v24, %v811_v23 }
 0x625   :  { %1911 = vmatmul.mubr.msk.f32.vlgmr.msra.gmra.mxu0 %vm192_vm4, %v813_v25 }
 0x626   :  { %1932 = vmatprep.mubr.msk.f32.mxu0 %vm2222_vm0, %v2221_v0  ;;  %1925 = vmatpush3.msra.mxu0 %v2435_v26 }
 0x627   :  { %1926 = vmatprep.subr.mxu0 %v2221_v0 }
 0x628   :  { %1927 = vmatpush3.msra.mxu0 %v2438_v28 }
 0x629   :  { %1928 = vmatprep.subr.mxu0 %v2221_v0 }
 0x62a   :  { %1929 = vmatpush3.msra.mxu0 %v2441_v30 }
 0x62b   :  { %1930 = vmatprep.subr.mxu0 %v2221_v0 }
 0x62c   :  { %1931 = vmatpush3.msra.mxu0 %v2445_v32 }
 0x62d   :  { %1933 = vmatmul.mubr.f32.vlgmr.msra.gmra.mxu0 %v2221_v0  ;;  %1946 = vmatprep.subr.mxu0 %v2221_v0 }
 0x62e   :  { %1947 = vmatpush3.msra.mxu0 %v2435_v26  ;;  %1954 = vmatprep.mubr.msk.f32.mxu0 %vm2222_vm0, %v2221_v0 }
 0x62f   :  { %1948 = vmatprep.subr.mxu0 %v2221_v0 }
 0x630   :  { %1949 = vmatpush3.msra.mxu0 %v2438_v28 }
 0x631   :  { %1950 = vmatprep.subr.mxu0 %v2221_v0 }
 0x632   :  { %1951 = vmatpush3.msra.mxu0 %v2441_v30 }
 0x633   :  { %1952 = vmatprep.subr.mxu0 %v2221_v0 }
 0x634   :  { %1953 = vmatpush3.msra.mxu0 %v2445_v32 }
 0x635   :  { %1968 = vmatprep.subr.mxu0 %v2221_v0 }
 0x6e5   :  { %v882_v34 = vpop.f32.mrf.mxu0 }
 0x6e6   :  { %v887_v35 = vrot.slane %v882_v34, 1  ;;  %v888_v36 = vrot.slane %v882_v34, 2 }
 0x6e7   :  { %v1912_v37 = vpop.f32.mrf.mxu0 }
 0x6e8   :  { %v891_v38 = vadd.f32 %v887_v35, %v2340_v13  ;;  %v892_v39 = vadd.f32 %v888_v36, %v2338_v12 }
 0x6ea   :  { %2050 = vtanh.f32 %v891_v38 }
 0x6eb   :  { %2052 = vtanh.f32 %v892_v39 }
 0x6ed   :  { %v1062_v12 = vpop.f32.mrf.mxu0 }
 0x6ee   :  { %v1067_v45 = vrot.slane %v1062_v12, 1 }
 0x6ef   :  { %v1934_v13 = vpop.f32.mrf.mxu0 }
 0x6f7   :  { %v2051_v40 = vpop.eup %2050 }
 0x6f8   :  { %v2053_v41 = vpop.eup %2052  ;;  %896 = vst.msk [vmem:[#allocation11] sm:$0x80] %vm895_vm11, %v2051_v40 }
 0x6f9   :  { %897 = vst.msk [vmem:[#allocation11 + $0x8] sm:$0x80] %vm895_vm11, %v2053_v41 }
 0x6ff   :  { %v898_v42 = vld [vmem:[#allocation11] sm:$0xff] }
 0x700   :  { %1921 = vmatprep.mubr.msk.f32.mxu1 %vm192_vm4, %v898_v42  ;;  %v899_v43 = vld [vmem:[#allocation11 + $0x8] sm:$0xff] }
 0x701   :  { %1922 = vmatmul.mubr.msk.f32.vlgmr.msra.gmra.mxu1 %vm192_vm4, %v899_v43 }
 0x702   :  { %1936 = vmatpush3.msra.mxu1 %v2435_v26  ;;  %1943 = vmatprep.mubr.msk.f32.mxu1 %vm2222_vm0, %v2221_v0 }
 0x703   :  { %1937 = vmatprep.subr.mxu1 %v2221_v0 }
 0x704   :  { %1938 = vmatpush3.msra.mxu1 %v2438_v28 }
 0x705   :  { %1939 = vmatprep.subr.mxu1 %v2221_v0 }
 0x706   :  { %1940 = vmatpush3.msra.mxu1 %v2441_v30 }
 0x707   :  { %1941 = vmatprep.subr.mxu1 %v2221_v0 }
 0x708   :  { %1942 = vmatpush3.msra.mxu1 %v2445_v32 }
 0x709   :  { %1957 = vmatprep.subr.mxu1 %v2221_v0 }
 0x7c1   :  { %v1923_v46 = vpop.f32.mrf.mxu1 }
 0x7c2   :  { %v2482_v47 = vadd.f32 %v1923_v46, %v1718_v44 }
 0x7c3   :  { %v987_v48 = vpop.f32.mrf.mxu1 }
 0x7c4   :  { %v2484_v49 = vadd.f32 %v1718_v44, %v987_v48  ;;  %v1071_v50 = vadd.f32 %v1067_v45, %v2482_v47 }
 0x7c6   :  { %v1070_v51 = vadd.f32 %v1062_v12, %v2484_v49  ;;  %2054 = vtanh.f32 %v1071_v50 }
 0x7c8   :  { %2056 = vtanh.f32 %v1070_v51 }
 0x7d3   :  { %v2055_v52 = vpop.eup %2054 }
 0x7d4   :  { %v1078_v53 = vrot.slane %v2055_v52, 7  ;;  %1075 = vst.msk [vmem:[#allocation11 + $0x8] sm:$0x1] %vm274_vm2, %v2055_v52 }
 0x7d5   :  { %v2057_v54 = vpop.eup %2056 }
 0x7d6   :  { %1074 = vst.msk [vmem:[#allocation11] sm:$0x1] %vm274_vm2, %v2057_v54  ;;  %v1079_v55 = vsel %vm280_vm3, %v1078_v53, %v2057_v54 }
 0x7d7   :  { %1944 = vmatmul.mubr.msk.f32.vlgmr.msra.gmra.mxu1 %vm192_vm4, %v1079_v55 }
 0x7d8   :  { %1958 = vmatpush3.msra.mxu1 %v2435_v26  ;;  %1965 = vmatprep.mubr.msk.f32.mxu1 %vm2222_vm0, %v2221_v0 }
 0x7d9   :  { %1959 = vmatprep.subr.mxu1 %v2221_v0 }
 0x7da   :  { %1960 = vmatpush3.msra.mxu1 %v2438_v28 }
 0x7db   :  { %1961 = vmatprep.subr.mxu1 %v2221_v0 }
 0x7dc   :  { %1962 = vmatpush3.msra.mxu1 %v2441_v30 }
 0x7dd   :  { %1963 = vmatprep.subr.mxu1 %v2221_v0 }
 0x7de   :  { %1964 = vmatpush3.msra.mxu1 %v2445_v32 }
 0x7df   :  { %1979 = vmatprep.subr.mxu1 %v2221_v0 }
 0x897   :  { %v1148_v56 = vpop.f32.mrf.mxu1 }
 0x898   :  { %v1153_v57 = vrot.slane %v1148_v56, 7  ;;  %v1157_v58 = vadd.f32 %v1148_v56, %v2482_v47 }
 0x899   :  { %v1945_v59 = vpop.f32.mrf.mxu1 }
 0x89a   :  { %v1156_v60 = vadd.f32 %v1153_v57, %v2484_v49  ;;  %2058 = vtanh.f32 %v1157_v58 }
 0x89c   :  { %2060 = vtanh.f32 %v1156_v60 }
 0x8a7   :  { %v2059_v61 = vpop.eup %2058 }
 0x8a8   :  { %1161 = vst.msk [vmem:[#allocation11 + $0x8] sm:$0x2] %vm362_vm5, %v2059_v61 }
 0x8a9   :  { %v2061_v62 = vpop.eup %2060 }
 0x8aa   :  { %1160 = vst.msk [vmem:[#allocation11] sm:$0x2] %vm362_vm5, %v2061_v62  ;;  %v1164_v63 = vrot.slane %v2061_v62, 1 }
 0x8ac   :  { %v1165_v1 = vsel %vm280_vm3, %v2059_v61, %v1164_v63 }
 0x8ad   :  { %1955 = vmatmul.mubr.msk.f32.vlgmr.msra.gmra.mxu0 %vm192_vm4, %v1165_v1 }
 0x8ae   :  { %1969 = vmatpush3.msra.mxu0 %v2435_v26  ;;  %1976 = vmatprep.mubr.msk.f32.mxu0 %vm2222_vm0, %v2221_v0 }
 0x8af   :  { %1970 = vmatprep.subr.mxu0 %v2221_v0 }
 0x8b0   :  { %1971 = vmatpush3.msra.mxu0 %v2438_v28 }
 0x8b1   :  { %1972 = vmatprep.subr.mxu0 %v2221_v0 }
 0x8b2   :  { %1973 = vmatpush3.msra.mxu0 %v2441_v30 }
 0x8b3   :  { %1974 = vmatprep.subr.mxu0 %v2221_v0 }
 0x8b4   :  { %1975 = vmatpush3.msra.mxu0 %v2445_v32 }
 0x8b5   :  { %1990 = vmatprep.subr.mxu0 %v2221_v0 }
 0x96d   :  { %v1234_v3 = vpop.f32.mrf.mxu0 }
 0x96e   :  { %v1239_v5 = vrot.slane %v1234_v3, 6  ;;  %v1240_v2 = vrot.slane %v1234_v3, 7 }
 0x96f   :  { %v1956_v6 = vpop.f32.mrf.mxu0 }
 0x970   :  { %v1243_v9 = vadd.f32 %v1239_v5, %v2484_v49  ;;  %v1244_v10 = vadd.f32 %v1240_v2, %v2482_v47 }
 0x972   :  { %2062 = vtanh.f32 %v1243_v9 }
 0x973   :  { %2064 = vtanh.f32 %v1244_v10 }
 0x97f   :  { %v2063_v4 = vpop.eup %2062 }
 0x980   :  { %v2065_v11 = vpop.eup %2064  ;;  %1247 = vst.msk [vmem:[#allocation11] sm:$0x4] %vm450_vm6, %v2063_v4  ;;  %v1251_v7 = vrot.slane %v2063_v4, 2 }
 0x981   :  { %1248 = vst.msk [vmem:[#allocation11 + $0x8] sm:$0x4] %vm450_vm6, %v2065_v11  ;;  %v1252_v8 = vrot.slane %v2065_v11, 1 }
 0x983   :  { %v1253_v14 = vsel %vm280_vm3, %v1252_v8, %v1251_v7 }
 0x984   :  { %1966 = vmatmul.mubr.msk.f32.vlgmr.msra.gmra.mxu1 %vm192_vm4, %v1253_v14 }
 0x985   :  { %1980 = vmatpush3.msra.mxu1 %v2435_v26  ;;  %1987 = vmatprep.mubr.msk.f32.mxu1 %vm2222_vm0, %v2221_v0 }
 0x986   :  { %1981 = vmatprep.subr.mxu1 %v2221_v0 }
 0x987   :  { %1982 = vmatpush3.msra.mxu1 %v2438_v28 }
 0x988   :  { %1983 = vmatprep.subr.mxu1 %v2221_v0 }
 0x989   :  { %1984 = vmatpush3.msra.mxu1 %v2441_v30 }
 0x98a   :  { %1985 = vmatprep.subr.mxu1 %v2221_v0 }
 0x98b   :  { %1986 = vmatpush3.msra.mxu1 %v2445_v32 }
 0x98c   :  { %2001 = vmatprep.subr.mxu1 %v2221_v0 }
 0xa44   :  { %v1322_v15 = vpop.f32.mrf.mxu1 }
 0xa45   :  { %v1327_v16 = vrot.slane %v1322_v15, 5  ;;  %v1328_v17 = vrot.slane %v1322_v15, 6 }
 0xa46   :  { %v1967_v18 = vpop.f32.mrf.mxu1 }
 0xa47   :  { %v1331_v19 = vadd.f32 %v1327_v16, %v2484_v49  ;;  %v1332_v20 = vadd.f32 %v1328_v17, %v2482_v47 }
 0xa49   :  { %2066 = vtanh.f32 %v1331_v19 }
 0xa4a   :  { %2068 = vtanh.f32 %v1332_v20 }
 0xa56   :  { %v2067_v21 = vpop.eup %2066 }
 0xa57   :  { %v2069_v22 = vpop.eup %2068  ;;  %1335 = vst.msk [vmem:[#allocation11] sm:$0x8] %vm539_vm7, %v2067_v21  ;;  %v1339_v23 = vrot.slane %v2067_v21, 3 }
 0xa58   :  { %1336 = vst.msk [vmem:[#allocation11 + $0x8] sm:$0x8] %vm539_vm7, %v2069_v22  ;;  %v1340_v24 = vrot.slane %v2069_v22, 2 }
 0xa5a   :  { %v1341_v25 = vsel %vm280_vm3, %v1340_v24, %v1339_v23 }
 0xa5b   :  { %1977 = vmatmul.mubr.msk.f32.vlgmr.msra.gmra.mxu0 %vm192_vm4, %v1341_v25 }
 0xa5c   :  { %1991 = vmatpush3.msra.mxu0 %v2435_v26  ;;  %1998 = vmatprep.mubr.msk.f32.mxu0 %vm2222_vm0, %v2221_v0 }
 0xa5d   :  { %1992 = vmatprep.subr.mxu0 %v2221_v0 }
 0xa5e   :  { %1993 = vmatpush3.msra.mxu0 %v2438_v28 }
 0xa5f   :  { %1994 = vmatprep.subr.mxu0 %v2221_v0 }
 0xa60   :  { %1995 = vmatpush3.msra.mxu0 %v2441_v30 }
 0xa61   :  { %1996 = vmatprep.subr.mxu0 %v2221_v0 }
 0xa62   :  { %1997 = vmatpush3.msra.mxu0 %v2445_v32 }
 0xb1b   :  { %v1410_v27 = vpop.f32.mrf.mxu0 }
 0xb1c   :  { %v1415_v29 = vrot.slane %v1410_v27, 4  ;;  %v1416_v31 = vrot.slane %v1410_v27, 5 }
 0xb1d   :  { %v1978_v33 = vpop.f32.mrf.mxu0 }
 0xb1e   :  { %v1419_v34 = vadd.f32 %v1415_v29, %v2484_v49  ;;  %v1420_v35 = vadd.f32 %v1416_v31, %v2482_v47 }
 0xb20   :  { %2070 = vtanh.f32 %v1419_v34 }
 0xb21   :  { %2072 = vtanh.f32 %v1420_v35 }
 0xb2d   :  { %v2071_v36 = vpop.eup %2070 }
 0xb2e   :  { %v2073_v37 = vpop.eup %2072  ;;  %1423 = vst.msk [vmem:[#allocation11] sm:$0x10] %vm628_vm8, %v2071_v36  ;;  %v1427_v38 = vrot.slane %v2071_v36, 4 }
 0xb2f   :  { %1424 = vst.msk [vmem:[#allocation11 + $0x8] sm:$0x10] %vm628_vm8, %v2073_v37  ;;  %v1428_v39 = vrot.slane %v2073_v37, 3 }
 0xb31   :  { %v1429_v40 = vsel %vm280_vm3, %v1428_v39, %v1427_v38 }
 0xb32   :  { %1988 = vmatmul.mubr.msk.f32.vlgmr.msra.gmra.mxu1 %vm192_vm4, %v1429_v40 }
 0xb33   :  { %2002 = vmatpush3.msra.mxu1 %v2435_v26  ;;  %2009 = vmatprep.mubr.msk.f32.mxu1 %vm2222_vm0, %v2221_v0 }
 0xb34   :  { %2003 = vmatprep.subr.mxu1 %v2221_v0 }
 0xb35   :  { %2004 = vmatpush3.msra.mxu1 %v2438_v28 }
 0xb36   :  { %2005 = vmatprep.subr.mxu1 %v2221_v0 }
 0xb37   :  { %2006 = vmatpush3.msra.mxu1 %v2441_v30 }
 0xb38   :  { %2007 = vmatprep.subr.mxu1 %v2221_v0 }
 0xb39   :  { %2008 = vmatpush3.msra.mxu1 %v2445_v32 }
 0xbf2   :  { %v1498_v41 = vpop.f32.mrf.mxu1 }
 0xbf3   :  { %v1503_v42 = vrot.slane %v1498_v41, 3  ;;  %v1504_v43 = vrot.slane %v1498_v41, 4 }
 0xbf4   :  { %v1989_v12 = vpop.f32.mrf.mxu1 }
 0xbf5   :  { %v1507_v26 = vadd.f32 %v1503_v42, %v2484_v49  ;;  %v1508_v13 = vadd.f32 %v1504_v43, %v2482_v47 }
 0xbf7   :  { %2074 = vtanh.f32 %v1507_v26 }
 0xbf8   :  { %2076 = vtanh.f32 %v1508_v13 }
 0xc04   :  { %v2075_v44 = vpop.eup %2074 }
 0xc05   :  { %v2077_v28 = vpop.eup %2076  ;;  %1511 = vst.msk [vmem:[#allocation11] sm:$0x20] %vm717_vm9, %v2075_v44  ;;  %v1515_v45 = vrot.slane %v2075_v44, 5 }
 0xc06   :  { %1512 = vst.msk [vmem:[#allocation11 + $0x8] sm:$0x20] %vm717_vm9, %v2077_v28  ;;  %v1516_v0 = vrot.slane %v2077_v28, 4 }
 0xc08   :  { %v1517_v30 = vsel %vm280_vm3, %v1516_v0, %v1515_v45 }
 0xc09   :  { %1999 = vmatmul.mubr.msk.f32.vlgmr.msra.gmra.mxu0 %vm192_vm4, %v1517_v30 }
 0xcc9   :  { %v1586_v32 = vpop.f32.mrf.mxu0 }
 0xcca   :  { %v1591_v46 = vrot.slane %v1586_v32, 2  ;;  %v1592_v48 = vrot.slane %v1586_v32, 3 }
 0xccb   :  { %v2000_v50 = vpop.f32.mrf.mxu0 }
 0xccc   :  { %v1595_v51 = vadd.f32 %v1591_v46, %v2484_v49  ;;  %v1596_v52 = vadd.f32 %v1592_v48, %v2482_v47 }
 0xcce   :  { %2078 = vtanh.f32 %v1595_v51 }
 0xccf   :  { %2080 = vtanh.f32 %v1596_v52 }
 0xcdb   :  { %v2079_v53 = vpop.eup %2078 }
 0xcdc   :  { %v2081_v54 = vpop.eup %2080  ;;  %1599 = vst.msk [vmem:[#allocation11] sm:$0x40] %vm806_vm10, %v2079_v53  ;;  %v1603_v55 = vrot.slane %v2079_v53, 6 }
 0xcdd   :  { %1600 = vst.msk [vmem:[#allocation11 + $0x8] sm:$0x40] %vm806_vm10, %v2081_v54  ;;  %v1604_v56 = vrot.slane %v2081_v54, 5 }
 0xcdf   :  { %v1605_v57 = vsel %vm280_vm3, %v1604_v56, %v1603_v55 }
 0xce0   :  { %2010 = vmatmul.mubr.msk.f32.vlgmr.msra.gmra.mxu1 %vm192_vm4, %v1605_v57 }
 0xda0   :  { %v1674_v58 = vpop.f32.mrf.mxu1 }
 0xda1   :  { %v1679_v59 = vrot.slane %v1674_v58, 1  ;;  %v1680_v60 = vrot.slane %v1674_v58, 2 }
 0xda2   :  { %v2011_v61 = vpop.f32.mrf.mxu1 }
 0xda3   :  { %v1683_v62 = vadd.f32 %v1679_v59, %v2484_v49  ;;  %v1684_v63 = vadd.f32 %v1680_v60, %v2482_v47 }
 0xda5   :  { %2082 = vtanh.f32 %v1683_v62 }
 0xda6   :  { %2084 = vtanh.f32 %v1684_v63 }
 0xdb2   :  { %v2083_v1 = vpop.eup %2082 }
 0xdb3   :  { %v2085_v3 = vpop.eup %2084  ;;  %1687 = vst.msk [vmem:[#allocation11] sm:$0x80] %vm895_vm11, %v2083_v1 }
 0xdb4   :  { %1688 = vst.msk [vmem:[#allocation11 + $0x8] sm:$0x80] %vm895_vm11, %v2085_v3 }
 0xdb5   :  { %2197 = shalt.err (!%p2194_p1)
}
 0xdb6   :  { %1700 = dma.vmem_to_hbm [thread:$0]  %s1695_s26, 256, %s2593_s7, [#allocation4], %s2216_s29, %s2216_s29, %s2217_s30  }
 0xdb7   :  { %2212 = dma.done.wait [#allocation4], 256  }
 0xdb8   :  { %2213 = vsyncadd [#allocation4], 4294967040 }
 0xdb9   :  { %1704 = vsyncpa [#allocation3], 1 }
 0xdba   :  { %1705 = vsyncpa [#allocation6], 1 }
 0xdbb   :  { %1706 = vsyncpa [#allocation9], 1 }
 0xdbc   :  { %1707 = vsyncpa [#allocation4], 1 }

</bundles_post_ra>
